<compile_context>
chip_gen: v6e
topology: v6e:2x2x1
jax: 0.10.0
libtpu: 0.0.40
codegen_flags: <defaults>
</compile_context>

<pallas_src>
import jax
import jax.numpy as jnp
from jax.experimental import pallas as pl
from jax.experimental.pallas import tpu as pltpu

_LANE = 128      # TPU lane width: output/input lane axis is padded/tiled to this
_TB_MAX = 8192   # batch tile along the lane axis (safe on v5e/v6e/v7x VMEM budgets)


def _round_up(n: int, m: int) -> int:
    return ((n + m - 1) // m) * m


def _fused_linear_kernel(xT_ref, w_ref, b_ref, oT_ref):
    """y[:, j] = sum_k w[k] * xT[k, j] + b  computed on the VPU.

    xT_ref: (in_f, TB) f32 VMEM block (batch on lanes)
    w_ref:  (in_f,)    f32 SMEM scalars (fc.weight row)
    b_ref:  (1,)       f32 SMEM scalar  (fc.bias)
    oT_ref: (1, TB)    f32 VMEM block (lane-dense output)
    """
    in_f = xT_ref.shape[0]
    acc = xT_ref[0:1, :] * w_ref[0]
    for k in range(1, in_f):               # in_f == 3: fully unrolled at trace time
        acc = acc + xT_ref[k:k + 1, :] * w_ref[k]
    oT_ref[...] = (acc + b_ref[0]).astype(oT_ref.dtype)


def non_standard_io_forward(x: dict, w_flat: jax.Array, b_flat: jax.Array) -> dict:
    """Pallas equivalent of NonStandardIOModel.forward.

    x:      {'data1': (B, 3), 'data2': (B, 3)} float32
    w_flat: (3,) float32  -- fc.weight reshaped once at setup time
    b_flat: (1,) float32  -- fc.bias
    Returns {'res1': (B, 1), 'res2': (B, 1)}.
    """
    x1, x2 = x["data1"], x["data2"]
    B, in_f = x1.shape
    N = 2 * B

    # Fuse both inputs and make batch the lane axis: (2B, 3) -> (3, 2B).
    xT = jnp.concatenate([x1, x2], axis=0).astype(jnp.float32).T

    # Lane-axis tile: multiple of 128, capped for VMEM; pad batch up to a tile.
    TB = min(_TB_MAX, _round_up(N, _LANE))
    N_pad = _round_up(N, TB)
    if N_pad != N:
        xT = jnp.pad(xT, ((0, 0), (0, N_pad - N)))

    grid = (N_pad // TB,)

    yT = pl.pallas_call(
        _fused_linear_kernel,
        out_shape=jax.ShapeDtypeStruct((1, N_pad), jnp.float32),
        grid=grid,
        in_specs=[
            pl.BlockSpec((in_f, TB), lambda i: (0, i)),                 # (3, TB) tile
            pl.BlockSpec(memory_space=pltpu.MemorySpace.SMEM),          # weight scalars
            pl.BlockSpec(memory_space=pltpu.MemorySpace.SMEM),          # bias scalar
        ],
        out_specs=pl.BlockSpec((1, TB), lambda i: (0, i)),              # lane-dense out
        compiler_params=pltpu.CompilerParams(
            dimension_semantics=("parallel",),  # shard batch tiles across v7x's 2 TCs
        ),
    )(xT, w_flat, b_flat)

    y = yT[0, :N]                           # drop lane padding
    return {
        "res1": y[:B].reshape(B, 1),
        "res2": y[B:].reshape(B, 1),
    }


if __name__ == "__main__":
    key = jax.random.PRNGKey(0)
    k_w, k_b, k_x1, k_x2 = jax.random.split(key, 4)

    in_features, out_features = 3, 1
    batch = 8

    # Deterministic parameter init (mimics PyTorch Linear's U(-1/sqrt(fan_in), ...)).
    bound = 1.0 / float(in_features) ** 0.5
    weight = jax.random.uniform(
        k_w, (out_features, in_features), jnp.float32, -bound, bound
    )
    bias = jax.random.uniform(k_b, (out_features,), jnp.float32, -bound, bound)

    # One-time parameter repack (done at setup, not per forward call).
    w_flat = weight.reshape(-1).astype(jnp.float32)   # (3,)
    b_flat = bias.reshape(-1).astype(jnp.float32)     # (1,)

    x = {
        "data1": jax.random.normal(k_x1, (batch, in_features), jnp.float32),
        "data2": jax.random.normal(k_x2, (batch, in_features), jnp.float32),
    }

    fwd = jax.jit(non_standard_io_forward)
    out = fwd(x, w_flat, b_flat)
    jax.block_until_ready(out)

    # Reference check against plain JAX (same math as torch.nn.Linear).
    ref1 = x["data1"] @ weight.T + bias
    ref2 = x["data2"] @ weight.T + bias
    assert out["res1"].shape == (batch, out_features)
    assert out["res2"].shape == (batch, out_features)
    assert jnp.allclose(out["res1"], ref1, atol=1e-5)
    assert jnp.allclose(out["res2"], ref2, atol=1e-5)

    print("KERNEL_OK")
</pallas_src>

<mosaic_0001>
module attributes {stable_mosaic.version = 11 : i64} {
  func.func @_fused_linear_kernel(%arg0: i32, %arg1: memref<3x128xf32, #tpu.memory_space<vmem>>, %arg2: memref<3xf32, #tpu.memory_space<smem>>, %arg3: memref<1xf32, #tpu.memory_space<smem>>, %arg4: memref<1x128xf32, #tpu.memory_space<vmem>>) attributes {dimension_semantics = [#tpu.dimension_semantics<parallel>], iteration_bounds = array<i64: 1>, scalar_prefetch = 0 : i64, scratch_operands = 0 : i64, tpu.core_type = #tpu.core_type<tc>, window_params = [{transform_indices = @transform_0, window_bounds = array<i64: 3, 128>}, {transform_indices = @transform_1, window_bounds = array<i64: 3>}, {transform_indices = @transform_2, window_bounds = array<i64: 1>}, {transform_indices = @transform_3, window_bounds = array<i64: 1, 128>}]} {
    %c0 = arith.constant 0 : index
    %c0_0 = arith.constant 0 : index
    %0 = vector.load %arg1[%c0, %c0_0] : memref<3x128xf32, #tpu.memory_space<vmem>>, vector<1x128xf32>
    %c0_1 = arith.constant 0 : index
    %1 = memref.load %arg2[%c0_1] : memref<3xf32, #tpu.memory_space<smem>>
    %2 = vector.broadcast %1 : f32 to vector<1x128xf32>
    %3 = arith.mulf %0, %2 : vector<1x128xf32>
    %c1 = arith.constant 1 : index
    %c0_2 = arith.constant 0 : index
    %4 = vector.load %arg1[%c1, %c0_2] : memref<3x128xf32, #tpu.memory_space<vmem>>, vector<1x128xf32>
    %c1_3 = arith.constant 1 : index
    %5 = memref.load %arg2[%c1_3] : memref<3xf32, #tpu.memory_space<smem>>
    %6 = vector.broadcast %5 : f32 to vector<1x128xf32>
    %7 = arith.mulf %4, %6 : vector<1x128xf32>
    %8 = arith.addf %3, %7 : vector<1x128xf32>
    %c2 = arith.constant 2 : index
    %c0_4 = arith.constant 0 : index
    %9 = vector.load %arg1[%c2, %c0_4] : memref<3x128xf32, #tpu.memory_space<vmem>>, vector<1x128xf32>
    %c2_5 = arith.constant 2 : index
    %10 = memref.load %arg2[%c2_5] : memref<3xf32, #tpu.memory_space<smem>>
    %11 = vector.broadcast %10 : f32 to vector<1x128xf32>
    %12 = arith.mulf %9, %11 : vector<1x128xf32>
    %13 = arith.addf %8, %12 : vector<1x128xf32>
    %c0_6 = arith.constant 0 : index
    %14 = memref.load %arg3[%c0_6] : memref<1xf32, #tpu.memory_space<smem>>
    %15 = vector.broadcast %14 : f32 to vector<1x128xf32>
    %16 = arith.addf %13, %15 : vector<1x128xf32>
    %c0_7 = arith.constant 0 : index
    %c0_8 = arith.constant 0 : index
    %17 = vector.load %arg4[%c0_7, %c0_8] : memref<1x128xf32, #tpu.memory_space<vmem>>, vector<1x128xf32>
    tpu.vector_store %arg4[%c0_7, %c0_8], %16 {strides = array<i32>} : memref<1x128xf32, #tpu.memory_space<vmem>>, vector<1x128xf32>,
    return
  }
  func.func @transform_0(%arg0: i32) -> (i32, i32) {
    %c0_i32 = arith.constant 0 : i32
    %c0_i32_0 = arith.constant 0 : i32
    return %c0_i32, %arg0 : i32, i32
  }
  func.func @transform_1(%arg0: i32) -> i32 {
    %c0_i32 = arith.constant 0 : i32
    %c0_i32_0 = arith.constant 0 : i32
    return %c0_i32 : i32
  }
  func.func @transform_2(%arg0: i32) -> i32 {
    %c0_i32 = arith.constant 0 : i32
    %c0_i32_0 = arith.constant 0 : i32
    return %c0_i32 : i32
  }
  func.func @transform_3(%arg0: i32) -> (i32, i32) {
    %c0_i32 = arith.constant 0 : i32
    %c0_i32_0 = arith.constant 0 : i32
    return %c0_i32, %arg0 : i32, i32
  }
}

</mosaic_0001>

<bundles_post_ra>
// kernel: non_standard_io_forward.1
= control target key start
LH: loop header
LB: loop body
LE: loop exit
PB: predicated region body
PF: predicated region fallthrough
CT: control target
= control target key end

     0   :  { %9 = vsyncpa [#allocation4], 0  ;;  %s107_s0 = inlined_call_operand.vmem [shape: f32[3,128], index: 0, kind: input, shape index: {}]   ;;  %s108_s1 = inlined_call_operand.vmem [shape: f32[3], index: 1, kind: input, shape index: {}]   ;;  %s109_s2 = inlined_call_operand.<no memory space> [shape: f32[1], index: 2, kind: input, shape index: {}]   ;;  %s110_s3 = inlined_call_operand.vmem [shape: f32[1,128], index: 3, kind: output, shape index: {}]  }
   0x1   :  { %s18_s14 = sshll.u32 %s108_s1, 4  ;;  %s19_s14 = int_to_ptr.vmem [resolvable:$true] %s18_s14 }
   0x2   :  { %s54_s15 = scalar_lea.vmem %s19_s14, 16  ;;  %p59_p1 = scmp.lt.s32.totalorder %s19_s14, %s19_s14 }
   0x3   :  { %p55_p0 = scmp.ne.s32.totalorder %s19_s14, %s54_s15  ;;  %p60_p2 = scmp.lt.s32.totalorder %s54_s15, %s54_s15 }
   0x5   :  { %p61_p3 = por %p60_p2, %p59_p1 }
   0x7   :  { %p62_p4 = pnand %p61_p3, %p55_p0 }
   0x9   :  { %65 = shalt.err (!%p62_p4)
}
   0xa   :  { %s68_s16 = smov [#allocation3]  }
   0xb   :  { %21 = dma.vmem_to_smem %s19_s14, 16, %s68_s16, [#allocation4]  }
   0xc   :  { %66 = dma.done.wait [#allocation4], 16  }
   0xd   :  { %67 = vsyncadd [#allocation4], 4294967280 }
   0xe   :  { %27 = sfence }
   0xf   :  { %s29_s17 = sld [smem:[#allocation3]]  ;;  %v28_v0 = vld [vmem:[%s107_s0] sm:$0x1]  ;;  %v32_v1 = vld [vmem:[%s107_s0 + $0x1] sm:$0x1]  ;;  %v43_v10 = vstv %s109_s2 }
  0x10   :  { %s51_s18 = sld [smem:[#allocation3 + $0x1]]  ;;  %v37_v3 = vld [vmem:[%s107_s0 + $0x2] sm:$0x1] }
  0x11   :  { %s52_s19 = sld [smem:[#allocation3 + $0x2]] }
  0x15   :  { %v30_v2 = vstv %s29_s17 }
  0x16   :  { %v31_v4 = vmul.f32 %v30_v2, %v28_v0  ;;  %v34_v5 = vstv %s51_s18 }
  0x17   :  { %v35_v6 = vmul.f32 %v34_v5, %v32_v1  ;;  %v39_v7 = vstv %s52_s19 }
  0x18   :  { %v40_v8 = vmul.f32 %v39_v7, %v37_v3 }
  0x19   :  { %v36_v9 = vadd.f32 %v35_v6, %v31_v4 }
  0x1b   :  { %v41_v11 = vadd.f32 %v40_v8, %v36_v9 }
  0x1d   :  { %v44_v12 = vadd.f32 %v43_v10, %v41_v11 }
  0x1f   :  { %45 = vst [vmem:[%s110_s3] sm:$0x1] %v44_v12 }
  0x20   :  { %50 = vsyncpa [#allocation4], 1 }

</bundles_post_ra>
